<compile_context>
chip_gen: v7x
topology: tpu7x:2x2x1
jax: 0.10.0
libtpu: 0.0.40
codegen_flags: <defaults>
</compile_context>

<pallas_src>
import jax
import jax.numpy as jnp
from jax.experimental import pallas as pl
from jax.experimental.pallas import tpu as pltpu

SLAB = 128            # packed feature width (lanes)
X_LANES = 2           # CascadeNet input width
ACT_OFF = 2           # running activation starts at this lane
BIAS_LANE = SLAB - 1  # constant-1.0 lane (bias row of the packed weights)


def _round_up(n, m):
    return (n + m - 1) // m * m


def make_cascade_kernel(num_hidden, out_dim):
    """kernel(x_ref, w_ref, o_ref): one batch tile through the whole cascade."""

    def kernel(x_ref, w_ref, o_ref):
        x = x_ref[...]                                    # (TB, 2) f32
        tb = x.shape[0]
        lane = jax.lax.broadcasted_iota(jnp.int32, (tb, SLAB), 1)
        x0 = jnp.broadcast_to(x[:, 0:1], (tb, SLAB))
        x1 = jnp.broadcast_to(x[:, 1:2], (tb, SLAB))

        # Constant part of the slab: x at lanes 0-1, 1.0 at the bias lane.
        base = (jnp.where(lane == 0, x0, 0.0)
                + jnp.where(lane == 1, x1, 0.0)
                + jnp.where(lane == BIAS_LANE, 1.0, 0.0))
        # Initial running activation is x itself (lanes 2-3).
        slab = (base
                + jnp.where(lane == ACT_OFF, x0, 0.0)
                + jnp.where(lane == ACT_OFF + 1, x1, 0.0))

        for l in range(num_hidden):
            pre = jnp.dot(slab, w_ref[l], preferred_element_type=jnp.float32)
            # `pre` is nonzero only on this layer's activation lanes
            # (2 .. 2+H_l); tanh(0)=0 elsewhere, so just re-add x / bias lanes.
            slab = base + jnp.tanh(pre)

        # Output layer (no tanh); its weights are packed at lanes [0, out_dim).
        pre = jnp.dot(slab, w_ref[num_hidden],
                      preferred_element_type=jnp.float32)
        o_ref[...] = pre[:, 0:out_dim]

    return kernel


def init_params(key, hidden_layers, in_features=2, out_features=1,
                dtype=jnp.float32):
    """Deterministic init matching nn.Linear shapes.

    PyTorch Linear(in, out) stores weight (out, in); we keep W^T = (in, out)
    split into wx (rows multiplying x) and wo (rows multiplying the running
    activation), plus bias b of shape (1, out).
    """
    params = []
    prev = in_features
    sizes = list(hidden_layers) + [out_features]
    for h in sizes:
        k_w, k_b, key = jax.random.split(key, 3)
        fan_in = prev + in_features
        bound = 1.0 / jnp.sqrt(fan_in)
        w_t = jax.random.uniform(k_w, (fan_in, h), dtype,
                                 minval=-bound, maxval=bound)
        b = jax.random.uniform(k_b, (1, h), dtype, minval=-bound, maxval=bound)
        params.append((w_t[:in_features, :], w_t[in_features:, :], b))
        prev = h
    return params


def pack_params(params):
    """Pack [(wx, wo, b)] into one zero-padded (L, 128, 128) weight tensor.

    Hidden layer l writes its activations to lanes [2, 2+H_l); the final
    (output) layer writes to lanes [0, out_dim). Bias goes to row 127, which
    the slab keeps at a constant 1.0.
    """
    n_layers = len(params)
    w = jnp.zeros((n_layers, SLAB, SLAB), jnp.float32)
    for l, (wx, wo, b) in enumerate(params):
        h = wx.shape[1]
        prev = wo.shape[0]
        col0 = 0 if l == n_layers - 1 else ACT_OFF
        assert col0 + h <= BIAS_LANE, "layer too wide for the 128-lane slab"
        assert ACT_OFF + prev <= BIAS_LANE, "previous layer too wide for slab"
        w = w.at[l, 0:X_LANES, col0:col0 + h].set(wx)
        w = w.at[l, ACT_OFF:ACT_OFF + prev, col0:col0 + h].set(wo)
        w = w.at[l, BIAS_LANE, col0:col0 + h].set(b[0])
    return w


def cascade_forward(x, params, tile_b=512):
    num_hidden = len(params) - 1
    out_dim = params[-1][2].shape[-1]
    w_packed = pack_params(params)

    b = x.shape[0]
    tb = min(tile_b, _round_up(b, 8))
    bp = _round_up(b, tb)
    if bp != b:
        x = jnp.pad(x, ((0, bp - b), (0, 0)))
    n_tiles = bp // tb

    y = pl.pallas_call(
        make_cascade_kernel(num_hidden, out_dim),
        out_shape=jax.ShapeDtypeStruct((bp, out_dim), jnp.float32),
        grid=(n_tiles,),
        in_specs=[
            # Batch tile of x: pipelined / double-buffered across the grid.
            pl.BlockSpec((tb, X_LANES), lambda i: (i, 0)),
            # Packed weights: constant block index -> DMA'd once, VMEM-resident.
            pl.BlockSpec(w_packed.shape, lambda i: (0, 0, 0)),
        ],
        out_specs=pl.BlockSpec((tb, out_dim), lambda i: (i, 0)),
        compiler_params=pltpu.CompilerParams(
            dimension_semantics=("parallel",),   # v7x: shard tiles across TCs
            vmem_limit_bytes=32 * 1024 * 1024,
        ),
    )(x, w_packed)
    return y[:b]


def cascade_reference(x, params):
    """Pure-JAX reference identical to the PyTorch forward semantics."""
    out = x
    for wx, wo, b in params[:-1]:
        cat = jnp.concatenate([x, out], axis=1)
        w_t = jnp.concatenate([wx, wo], axis=0)
        out = jnp.tanh(cat @ w_t + b)
    wx, wo, b = params[-1]
    cat = jnp.concatenate([x, out], axis=1)
    w_t = jnp.concatenate([wx, wo], axis=0)
    return cat @ w_t + b


if __name__ == "__main__":
    key = jax.random.PRNGKey(0)
    k_x, k_p, k_x2 = jax.random.split(key, 3)

    hidden_layers = [32, 16]          # CascadeNet(hidden_layers=[32, 16])
    params = init_params(k_p, hidden_layers)

    # Small shape consistent with the module.
    x = jax.random.normal(k_x, (8, 2), jnp.float32)
    y = jax.block_until_ready(cascade_forward(x, params))
    assert y.shape == (8, 1)
    assert jnp.allclose(y, cascade_reference(x, params), atol=2e-5, rtol=2e-5)

    # Larger, ragged batch: exercises the pipelined batch grid + padding path.
    x2 = jax.random.normal(k_x2, (1000, 2), jnp.float32)
    y2 = jax.block_until_ready(cascade_forward(x2, params))
    assert y2.shape == (1000, 1)
    assert jnp.allclose(y2, cascade_reference(x2, params), atol=2e-5, rtol=2e-5)

    print("KERNEL_OK")
</pallas_src>

<mosaic_0001>
module attributes {stable_mosaic.version = 11 : i64} {
  func.func @kernel(%arg0: i32, %arg1: memref<8x2xf32, #tpu.memory_space<vmem>>, %arg2: memref<3x128x128xf32, #tpu.memory_space<vmem>>, %arg3: memref<8x1xf32, #tpu.memory_space<vmem>>) attributes {dimension_semantics = [#tpu.dimension_semantics<parallel>], iteration_bounds = array<i64: 1>, scalar_prefetch = 0 : i64, scratch_operands = 0 : i64, tpu.core_type = #tpu.core_type<tc>, window_params = [{transform_indices = @transform_0, window_bounds = array<i64: 8, 2>}, {pipeline_mode = #tpu.pipeline_mode<synchronous>, transform_indices = @transform_1, window_bounds = array<i64: 3, 128, 128>}, {transform_indices = @transform_2, window_bounds = array<i64: 8, 1>}]} {
    %c0 = arith.constant 0 : index
    %c0_0 = arith.constant 0 : index
    %0 = vector.load %arg1[%c0, %c0_0] : memref<8x2xf32, #tpu.memory_space<vmem>>, vector<8x2xf32>
    %1 = tpu.iota {dimensions = array<i32: 1>} : vector<8x128xi32>
    %2 = vector.extract_strided_slice %0 {offsets = [0, 0], sizes = [8, 1], strides = [1, 1]} : vector<8x2xf32> to vector<8x1xf32>
    %3 = vector.shape_cast %2 : vector<8x1xf32> to vector<8x1xf32>
    %4 = vector.broadcast %3 : vector<8x1xf32> to vector<8x128xf32>
    %5 = vector.extract_strided_slice %0 {offsets = [0, 1], sizes = [8, 1], strides = [1, 1]} : vector<8x2xf32> to vector<8x1xf32>
    %6 = vector.shape_cast %5 : vector<8x1xf32> to vector<8x1xf32>
    %7 = vector.broadcast %6 : vector<8x1xf32> to vector<8x128xf32>
    %c0_i32 = arith.constant 0 : i32
    %8 = vector.broadcast %c0_i32 : i32 to vector<8x128xi32>
    %9 = arith.cmpi eq, %1, %8 : vector<8x128xi32>
    %cst = arith.constant 0.000000e+00 : f32
    %10 = vector.broadcast %cst : f32 to vector<8x128xf32>
    %11 = arith.select %9, %4, %10 : vector<8x128xi1>, vector<8x128xf32>
    %c1_i32 = arith.constant 1 : i32
    %12 = vector.broadcast %c1_i32 : i32 to vector<8x128xi32>
    %13 = arith.cmpi eq, %1, %12 : vector<8x128xi32>
    %cst_1 = arith.constant 0.000000e+00 : f32
    %14 = vector.broadcast %cst_1 : f32 to vector<8x128xf32>
    %15 = arith.select %13, %7, %14 : vector<8x128xi1>, vector<8x128xf32>
    %16 = arith.addf %11, %15 : vector<8x128xf32>
    %c127_i32 = arith.constant 127 : i32
    %17 = vector.broadcast %c127_i32 : i32 to vector<8x128xi32>
    %18 = arith.cmpi eq, %1, %17 : vector<8x128xi32>
    %cst_2 = arith.constant 1.000000e+00 : f32
    %cst_3 = arith.constant 0.000000e+00 : f32
    %19 = vector.broadcast %cst_2 : f32 to vector<8x128xf32>
    %20 = vector.broadcast %cst_3 : f32 to vector<8x128xf32>
    %21 = arith.select %18, %19, %20 : vector<8x128xi1>, vector<8x128xf32>
    %22 = arith.addf %16, %21 : vector<8x128xf32>
    %c2_i32 = arith.constant 2 : i32
    %23 = vector.broadcast %c2_i32 : i32 to vector<8x128xi32>
    %24 = arith.cmpi eq, %1, %23 : vector<8x128xi32>
    %cst_4 = arith.constant 0.000000e+00 : f32
    %25 = vector.broadcast %cst_4 : f32 to vector<8x128xf32>
    %26 = arith.select %24, %4, %25 : vector<8x128xi1>, vector<8x128xf32>
    %27 = arith.addf %22, %26 : vector<8x128xf32>
    %c3_i32 = arith.constant 3 : i32
    %28 = vector.broadcast %c3_i32 : i32 to vector<8x128xi32>
    %29 = arith.cmpi eq, %1, %28 : vector<8x128xi32>
    %cst_5 = arith.constant 0.000000e+00 : f32
    %30 = vector.broadcast %cst_5 : f32 to vector<8x128xf32>
    %31 = arith.select %29, %7, %30 : vector<8x128xi1>, vector<8x128xf32>
    %32 = arith.addf %27, %31 : vector<8x128xf32>
    %c0_6 = arith.constant 0 : index
    %c0_7 = arith.constant 0 : index
    %c0_8 = arith.constant 0 : index
    %33 = vector.load %arg2[%c0_6, %c0_7, %c0_8] : memref<3x128x128xf32, #tpu.memory_space<vmem>>, vector<1x128x128xf32>
    %34 = vector.shape_cast %33 : vector<1x128x128xf32> to vector<128x128xf32>
    %cst_9 = arith.constant dense<0.000000e+00> : vector<8x128xf32>
    %35 = tpu.matmul %32, %34, %cst_9 {dimension_numbers = #tpu.dot_dimension_numbers<[1], [0], [0], [1], [0, 0, 1, 1], [], []>} : vector<8x128xf32>, vector<128x128xf32>, vector<8x128xf32> -> vector<8x128xf32>
    %36 = math.tanh %35 : vector<8x128xf32>
    %37 = arith.addf %22, %36 : vector<8x128xf32>
    %c1 = arith.constant 1 : index
    %c0_10 = arith.constant 0 : index
    %c0_11 = arith.constant 0 : index
    %38 = vector.load %arg2[%c1, %c0_10, %c0_11] : memref<3x128x128xf32, #tpu.memory_space<vmem>>, vector<1x128x128xf32>
    %39 = vector.shape_cast %38 : vector<1x128x128xf32> to vector<128x128xf32>
    %cst_12 = arith.constant dense<0.000000e+00> : vector<8x128xf32>
    %40 = tpu.matmul %37, %39, %cst_12 {dimension_numbers = #tpu.dot_dimension_numbers<[1], [0], [0], [1], [0, 0, 1, 1], [], []>} : vector<8x128xf32>, vector<128x128xf32>, vector<8x128xf32> -> vector<8x128xf32>
    %41 = math.tanh %40 : vector<8x128xf32>
    %42 = arith.addf %22, %41 : vector<8x128xf32>
    %c2 = arith.constant 2 : index
    %c0_13 = arith.constant 0 : index
    %c0_14 = arith.constant 0 : index
    %43 = vector.load %arg2[%c2, %c0_13, %c0_14] : memref<3x128x128xf32, #tpu.memory_space<vmem>>, vector<1x128x128xf32>
    %44 = vector.shape_cast %43 : vector<1x128x128xf32> to vector<128x128xf32>
    %cst_15 = arith.constant dense<0.000000e+00> : vector<8x128xf32>
    %45 = tpu.matmul %42, %44, %cst_15 {dimension_numbers = #tpu.dot_dimension_numbers<[1], [0], [0], [1], [0, 0, 1, 1], [], []>} : vector<8x128xf32>, vector<128x128xf32>, vector<8x128xf32> -> vector<8x128xf32>
    %46 = vector.extract_strided_slice %45 {offsets = [0, 0], sizes = [8, 1], strides = [1, 1]} : vector<8x128xf32> to vector<8x1xf32>
    %c0_16 = arith.constant 0 : index
    %c0_17 = arith.constant 0 : index
    %47 = vector.load %arg3[%c0_16, %c0_17] : memref<8x1xf32, #tpu.memory_space<vmem>>, vector<8x1xf32>
    tpu.vector_store %arg3[%c0_16, %c0_17], %46 {strides = array<i32>} : memref<8x1xf32, #tpu.memory_space<vmem>>, vector<8x1xf32>,
    return
  }
  func.func @transform_0(%arg0: i32) -> (i32, i32) {
    %c0_i32 = arith.constant 0 : i32
    %c0_i32_0 = arith.constant 0 : i32
    return %arg0, %c0_i32 : i32, i32
  }
  func.func @transform_1(%arg0: i32) -> (i32, i32, i32) {
    %c0_i32 = arith.constant 0 : i32
    %c0_i32_0 = arith.constant 0 : i32
    %c0_i32_1 = arith.constant 0 : i32
    %c0_i32_2 = arith.constant 0 : i32
    return %c0_i32, %c0_i32_0, %c0_i32_1 : i32, i32, i32
  }
  func.func @transform_2(%arg0: i32) -> (i32, i32) {
    %c0_i32 = arith.constant 0 : i32
    %c0_i32_0 = arith.constant 0 : i32
    return %arg0, %c0_i32 : i32, i32
  }
}

</mosaic_0001>

<bundles_post_ra>
// kernel: tpu_custom_call.1
= control target key start
LH: loop header
LB: loop body
LE: loop exit
PB: predicated region body
PF: predicated region fallthrough
CT: control target
= control target key end

     0   :  { %7 = vsyncpa [#allocation3], 0  ;;  %s588_s9 = smov [#allocation2]   ;;  %s665_s0 = inlined_call_operand.vmem [shape: f32[8,2], index: 0, kind: input, shape index: {}]   ;;  %s666_s1 = inlined_call_operand.hbm [shape: f32[3,128,128], index: 1, kind: input, shape index: {}]   ;;  %s667_s2 = inlined_call_operand.vmem [shape: f32[8,1], index: 2, kind: output, shape index: {}]  }
   0x1   :  { %s15_s10 = sshll.u32 %s588_s9, 4  ;;  %s564_s13 = scalar_lea.hbm %s666_s1, 6144  ;;  %s16_s10 = int_to_ptr.vmem [resolvable:$true] %s15_s10 }
   0x2   :  { %p565_p0 = scmp.ne.s32.totalorder %s666_s1, %s564_s13  ;;  %p568_p1 = scmp.lt.u32.totalorder %s564_s13, %s666_s1 }
   0x4   :  { %p570_p2 = pnand %p568_p1, %p565_p0 }
   0x6   :  { %573 = shalt.err (!%p570_p2)
}
   0x7   :  { %s574_s18 = scalar_lea.vmem %s16_s10, 6144  ;;  %p579_p4 = scmp.lt.s32.totalorder %s16_s10, %s16_s10 }
   0x8   :  { %p575_p3 = scmp.ne.s32.totalorder %s16_s10, %s574_s18  ;;  %p580_p5 = scmp.lt.s32.totalorder %s574_s18, %s574_s18 }
   0xa   :  { %p581_p6 = por %p580_p5, %p579_p4 }
   0xc   :  { %p582_p7 = pnand %p581_p6, %p575_p3 }
   0xe   :  { %585 = shalt.err (!%p582_p7)
}
   0xf   :  { %s589_s19 = smov 128   ;;  %s590_s20 = smov 8  }
  0x10   :  { %21 = dma.hbm_to_vmem [thread:$0]  %s666_s1, 6144, %s16_s10, [#allocation3], %s589_s19, %s589_s19, %s590_s20  }
  0x11   :  { %586 = dma.done.wait [#allocation3], 6144  }
  0x12   :  { %587 = vsyncadd [#allocation3], 4294961152  ;;  %v591_v0 = vmov 0   ;;  %v592_v1 = vmov 0.0|0.0   ;;  %v25_v2 = vld [vmem:[%s665_s0] sm:$0xff]  ;;  %v52_v4 = vld [vmem:[#allocation2 + $0x8] sm:$0xff]  ;;  %v26_v44 = vlaneseq }
  0x13   :  { %558 = vset.pattern.permute.xlu0 %v591_v0  ;;  %478 = vmatprep.subr.bf16.mxu0 %v592_v1  ;;  %v51_v3 = vld [vmem:[#allocation2] sm:$0xff]  ;;  %v53_v6 = vld [vmem:[#allocation2 + $0x10] sm:$0xff]  ;;  %v54_v7 = vld [vmem:[#allocation2 + $0x18] sm:$0xff]  ;;  %v593_v11 = vmov 1   ;;  %vm594_vm0 = vmmov 0   ;;  %v595_v18 = vmov 0.0  }
  0x14   :  { %502 = vmatprep.subr.bf16.mxu1 %v592_v1  ;;  %30 = vperm.xlu0 %558, %v25_v2   ;;  %v479_v5 = vpack.c.bf16 %v52_v4, %v51_v3  ;;  %v482_v8 = vpack.c.bf16 %v54_v7, %v53_v6  ;;  %v55_v9 = vld [vmem:[#allocation2 + $0x20] sm:$0xff]  ;;  %v56_v10 = vld [vmem:[#allocation2 + $0x28] sm:$0xff]  ;;  %v57_v13 = vld [vmem:[#allocation2 + $0x30] sm:$0xff]  ;;  %v27_v45 = vand.u32 127, %v26_v44  ;;  %vm315_vm6 = vcmask 7168  }
  0x15   :  { %v485_v12 = vpack.c.bf16 %v56_v10, %v55_v9  ;;  %v58_v14 = vld [vmem:[#allocation2 + $0x38] sm:$0xff]  ;;  %v59_v16 = vld [vmem:[#allocation2 + $0x40] sm:$0xff]  ;;  %v60_v17 = vld [vmem:[#allocation2 + $0x48] sm:$0xff]  ;;  %405 = vmatprep.mubr.msk.f32.mxu0 %vm594_vm0, %v595_v18  ;;  %440 = vmatprep.mubr.msk.f32.mxu1 %vm594_vm0, %v595_v18 }
  0x16   :  { %480 = vmatpush3.bf16.msra.mxu0 %v479_v5  ;;  %v488_v15 = vpack.c.bf16 %v58_v14, %v57_v13  ;;  %v491_v19 = vpack.c.bf16 %v60_v17, %v59_v16  ;;  %v140_v20 = vld [vmem:[#allocation2 + $0x80] sm:$0xff]  ;;  %v141_v21 = vld [vmem:[#allocation2 + $0x88] sm:$0xff]  ;;  %v142_v22 = vld [vmem:[#allocation2 + $0x90] sm:$0xff]  ;;  %vm37_vm1 = vcmp.eq.s32.totalorder %v27_v45, 0  ;;  %vm39_vm2 = vcmp.eq.s32.totalorder %v27_v45, 1 }
  0x17   :  { %481 = vmatprep.subr.bf16.mxu0 %v592_v1  ;;  %v61_v23 = vld [vmem:[#allocation2 + $0x50] sm:$0xff]  ;;  %v62_v24 = vld [vmem:[#allocation2 + $0x58] sm:$0xff]  ;;  %v503_v25 = vpack.c.bf16 %v141_v21, %v140_v20  ;;  %v144_v29 = vld [vmem:[#allocation2 + $0xa0] sm:$0xff]  ;;  %vm42_vm3 = vcmp.eq.s32.totalorder %v27_v45, 127  ;;  %vm45_vm4 = vcmp.eq.s32.totalorder %v27_v45, 2  ;;  %vm48_vm5 = vcmp.eq.s32.totalorder %v27_v45, 3 }
  0x18   :  { %559 = vset.pattern.permute.xlu0 %v593_v11  ;;  %v143_v26 = vld [vmem:[#allocation2 + $0x98] sm:$0xff]  ;;  %v494_v28 = vpack.c.bf16 %v62_v24, %v61_v23  ;;  %v145_v30 = vld [vmem:[#allocation2 + $0xa8] sm:$0xff]  ;;  %v63_v31 = vld [vmem:[#allocation2 + $0x60] sm:$0xff]  ;;  %v43_v49 = vsel %vm42_vm3, 1.0, %v595_v18 }
  0x19   :  { %34 = vperm.xlu0 %559, %v25_v2   ;;  %504 = vmatpush3.bf16.msra.mxu1 %v503_v25  ;;  %v506_v27 = vpack.c.bf16 %v143_v26, %v142_v22  ;;  %v64_v32 = vld [vmem:[#allocation2 + $0x68] sm:$0xff]  ;;  %v509_v33 = vpack.c.bf16 %v145_v30, %v144_v29  ;;  %v146_v35 = vld [vmem:[#allocation2 + $0xb0] sm:$0xff]  ;;  %v147_v36 = vld [vmem:[#allocation2 + $0xb8] sm:$0xff] }
  0x1a   :  { %483 = vmatpush3.bf16.msra.mxu0 %v482_v8  ;;  %505 = vmatprep.subr.bf16.mxu1 %v592_v1  ;;  %v497_v34 = vpack.c.bf16 %v64_v32, %v63_v31  ;;  %v65_v37 = vld [vmem:[#allocation2 + $0x70] sm:$0xff]  ;;  %v66_v38 = vld [vmem:[#allocation2 + $0x78] sm:$0xff]  ;;  %v512_v39 = vpack.c.bf16 %v147_v36, %v146_v35  ;;  %v148_v41 = vld [vmem:[#allocation2 + $0xc0] sm:$0xff] }
  0x1b   :  { %484 = vmatprep.subr.bf16.mxu0 %v592_v1  ;;  %v500_v40 = vpack.c.bf16 %v66_v38, %v65_v37  ;;  %v149_v42 = vld [vmem:[#allocation2 + $0xc8] sm:$0xff]  ;;  %v150_v57 = vld [vmem:[#allocation2 + $0xd0] sm:$0xff]  ;;  %v151_v58 = vld [vmem:[#allocation2 + $0xd8] sm:$0xff] }
  0x1c   :  { %v515_v43 = vpack.c.bf16 %v149_v42, %v148_v41  ;;  %v518_v59 = vpack.c.bf16 %v151_v58, %v150_v57  ;;  %v152_v60 = vld [vmem:[#allocation2 + $0xe0] sm:$0xff]  ;;  %v153_v61 = vld [vmem:[#allocation2 + $0xe8] sm:$0xff]  ;;  %v154_v63 = vld [vmem:[#allocation2 + $0xf0] sm:$0xff] }
  0x1d   :  { %507 = vmatpush3.bf16.msra.mxu1 %v506_v27  ;;  %v521_v62 = vpack.c.bf16 %v153_v61, %v152_v60  ;;  %v155_v0 = vld [vmem:[#allocation2 + $0xf8] sm:$0xff]  ;;  %v229_v3 = vld [vmem:[#allocation2 + $0x100] sm:$0xff]  ;;  %v230_v4 = vld [vmem:[#allocation2 + $0x108] sm:$0xff] }
  0x1e   :  { %486 = vmatpush3.bf16.msra.mxu0 %v485_v12  ;;  %508 = vmatprep.subr.bf16.mxu1 %v592_v1  ;;  %v524_v2 = vpack.c.bf16 %v155_v0, %v154_v63  ;;  %v231_v5 = vld [vmem:[#allocation2 + $0x110] sm:$0xff]  ;;  %v527_v6 = vpack.c.bf16 %v230_v4, %v229_v3  ;;  %v232_v7 = vld [vmem:[#allocation2 + $0x118] sm:$0xff]  ;;  %v233_v9 = vld [vmem:[#allocation2 + $0x120] sm:$0xff] }
  0x1f   :  { %487 = vmatprep.subr.bf16.mxu0 %v592_v1  ;;  %v530_v8 = vpack.c.bf16 %v232_v7, %v231_v5  ;;  %v234_v10 = vld [vmem:[#allocation2 + $0x128] sm:$0xff]  ;;  %v235_v12 = vld [vmem:[#allocation2 + $0x130] sm:$0xff]  ;;  %v236_v13 = vld [vmem:[#allocation2 + $0x138] sm:$0xff] }
  0x20   :  { %v533_v11 = vpack.c.bf16 %v234_v10, %v233_v9  ;;  %v536_v14 = vpack.c.bf16 %v236_v13, %v235_v12  ;;  %v238_v16 = vld [vmem:[#allocation2 + $0x148] sm:$0xff]  ;;  %v239_v22 = vld [vmem:[#allocation2 + $0x150] sm:$0xff]  ;;  %v240_v23 = vld [vmem:[#allocation2 + $0x158] sm:$0xff] }
  0x21   :  { %510 = vmatpush3.bf16.msra.mxu1 %v509_v33  ;;  %v542_v24 = vpack.c.bf16 %v240_v23, %v239_v22  ;;  %v241_v25 = vld [vmem:[#allocation2 + $0x160] sm:$0xff]  ;;  %v242_v26 = vld [vmem:[#allocation2 + $0x168] sm:$0xff]  ;;  %v244_v29 = vld [vmem:[#allocation2 + $0x178] sm:$0xff] }
  0x22   :  { %489 = vmatpush3.bf16.msra.mxu0 %v488_v15  ;;  %511 = vmatprep.subr.bf16.mxu1 %v592_v1  ;;  %v237_v15 = vld [vmem:[#allocation2 + $0x140] sm:$0xff]  ;;  %v545_v27 = vpack.c.bf16 %v242_v26, %v241_v25 }
  0x23   :  { %490 = vmatprep.subr.bf16.mxu0 %v592_v1  ;;  %v539_v17 = vpack.c.bf16 %v238_v16, %v237_v15 }
  0x25   :  { %513 = vmatpush3.bf16.msra.mxu1 %v512_v39 }
  0x26   :  { %492 = vmatpush3.bf16.msra.mxu0 %v491_v19  ;;  %514 = vmatprep.subr.bf16.mxu1 %v592_v1 }
  0x27   :  { %493 = vmatprep.subr.bf16.mxu0 %v592_v1 }
  0x29   :  { %516 = vmatpush3.bf16.msra.mxu1 %v515_v43 }
  0x2a   :  { %495 = vmatpush3.bf16.msra.mxu0 %v494_v28  ;;  %517 = vmatprep.subr.bf16.mxu1 %v592_v1  ;;  %v243_v28 = vld [vmem:[#allocation2 + $0x170] sm:$0xff] }
  0x2b   :  { %496 = vmatprep.subr.bf16.mxu0 %v592_v1  ;;  %v548_v30 = vpack.c.bf16 %v244_v29, %v243_v28 }
  0x2d   :  { %519 = vmatpush3.bf16.msra.mxu1 %v518_v59 }
  0x2e   :  { %498 = vmatpush3.bf16.msra.mxu0 %v497_v34  ;;  %520 = vmatprep.subr.bf16.mxu1 %v592_v1 }
  0x2f   :  { %499 = vmatprep.subr.bf16.mxu0 %v592_v1 }
  0x31   :  { %522 = vmatpush3.bf16.msra.mxu1 %v521_v62 }
  0x32   :  { %501 = vmatpush3.bf16.msra.mxu0 %v500_v40  ;;  %523 = vmatprep.subr.bf16.mxu1 %v592_v1 }
  0x33   :  { %526 = vmatprep.subr.bf16.mxu0 %v592_v1 }
  0x35   :  { %525 = vmatpush3.bf16.msra.mxu1 %v524_v2 }
  0x93   :  { %v31_v46 = vpop.permute.xlu0 %30 }
  0x94   :  { %v38_v48 = vsel %vm37_vm1, %v31_v46, 0.0  ;;  %v46_v53 = vsel %vm45_vm4, %v31_v46, 0.0 }
  0x98   :  { %v35_v47 = vpop.permute.xlu0 %34 }
  0x99   :  { %v40_v50 = vsel %vm39_vm2, %v35_v47, 0.0  ;;  %v49_v55 = vsel %vm48_vm5, %v35_v47, 0.0 }
  0x9a   :  { %v41_v51 = vadd.f32 %v40_v50, %v38_v48 }
  0x9c   :  { %v646_v52 = vadd.f32 %v43_v49, %v41_v51 }
  0x9e   :  { %v47_v54 = vadd.f32 %v46_v53, %v646_v52 }
  0xa0   :  { %v50_v56 = vadd.f32 %v49_v55, %v47_v54 }
  0xa2   :  { %406 = vmatmul.mubr.f32.vlgmr.msra.gmra.mrb[0].mxu0 %v50_v56 }
  0xa3   :  { %475 = vmatprep.mubr.msk.f32.mxu0 %vm594_vm0, %v595_v18  ;;  %528 = vmatpush3.bf16.msra.mxu0 %v527_v6 }
  0xa4   :  { %529 = vmatprep.subr.bf16.mxu0 %v592_v1 }
  0xa7   :  { %531 = vmatpush3.bf16.msra.mxu0 %v530_v8 }
  0xa8   :  { %532 = vmatprep.subr.bf16.mxu0 %v592_v1 }
  0xab   :  { %534 = vmatpush3.bf16.msra.mxu0 %v533_v11 }
  0xac   :  { %535 = vmatprep.subr.bf16.mxu0 %v592_v1 }
  0xaf   :  { %537 = vmatpush3.bf16.msra.mxu0 %v536_v14 }
  0xb0   :  { %538 = vmatprep.subr.bf16.mxu0 %v592_v1 }
  0xb3   :  { %540 = vmatpush3.bf16.msra.mxu0 %v539_v17 }
  0xb4   :  { %541 = vmatprep.subr.bf16.mxu0 %v592_v1 }
  0xb7   :  { %543 = vmatpush3.bf16.msra.mxu0 %v542_v24 }
  0xb8   :  { %544 = vmatprep.subr.bf16.mxu0 %v592_v1 }
  0xbb   :  { %546 = vmatpush3.bf16.msra.mxu0 %v545_v27 }
  0xbc   :  { %547 = vmatprep.subr.bf16.mxu0 %v592_v1 }
  0xbf   :  { %549 = vmatpush3.bf16.msra.mxu0 %v548_v30 }
 0x175   :  { %v133_v18 = vpop.f32.mrb[0].mxu0 }
 0x176   :  { %560 = vtanh.f32 %v133_v18  ;;  %v407_v19 = vpop.f32.mrb[1].mxu0 }
 0x180   :  { %v561_v20 = vpop.eup %560 }
 0x181   :  { %v138_v21 = vadd.f32 %v561_v20, %v646_v52 }
 0x183   :  { %441 = vmatmul.mubr.f32.vlgmr.msra.gmra.mrb[0].mxu1 %v138_v21 }
 0x256   :  { %v222_v31 = vpop.f32.mrb[0].mxu1 }
 0x257   :  { %562 = vtanh.f32 %v222_v31  ;;  %v442_v32 = vpop.f32.mrb[1].mxu1 }
 0x261   :  { %v563_v33 = vpop.eup %562 }
 0x262   :  { %v227_v34 = vadd.f32 %v563_v33, %v646_v52 }
 0x264   :  { %476 = vmatmul.mubr.f32.vlgmr.msra.gmra.mrb[2].mxu0 %v227_v34 }
 0x337   :  { %v311_v35 = vpop.f32.mrb[2].mxu0 }
 0x338   :  { %316 = vst.msk [vmem:[%s667_s2] sm:$0xff] %vm315_vm6, %v311_v35  ;;  %v477_v36 = vpop.f32.mrb[3].mxu0 }
 0x339   :  { %321 = vsyncpa [#allocation3], 1 }

</bundles_post_ra>
